<compile_context>
chip_gen: v7x
topology: tpu7x:2x2x1
jax: 0.10.0
libtpu: 0.0.40
codegen_flags: <defaults>
</compile_context>

<pallas_src>
import jax
import jax.numpy as jnp
from jax.experimental import pallas as pl
from jax.experimental.pallas import tpu as pltpu


def lmf_kernel(vx_ref, tx_ref, vfm_ref, vfb_ref, tfm_ref, tfb_ref,
               bias_ref, out_ref):
    """Single-shot LMF fusion for one batch tile.

    vx_ref  : VMEM (tm, Vh)      bf16  video input tile
    tx_ref  : VMEM (tm, To)      bf16  text input tile
    vfm_ref : VMEM (Vh, rank*D)  bf16  video factor rows 1.. (weights folded in)
    vfb_ref : VMEM (1, rank*D)   f32   video factor bias row (weights folded in)
    tfm_ref : VMEM (To, rank*D)  bf16  text factor rows 1..
    tfb_ref : VMEM (1, rank*D)   f32   text factor bias row
    bias_ref: VMEM (1, D)        f32   fusion_bias
    out_ref : VMEM (tm, D)       f32   output tile
    """
    # fv[b, r*D+d] == w_r * (concat([1, video_x]) @ video_factor[r])[b, d]
    fv = jnp.dot(vx_ref[...], vfm_ref[...],
                 preferred_element_type=jnp.float32) + vfb_ref[...]
    ft = jnp.dot(tx_ref[...], tfm_ref[...],
                 preferred_element_type=jnp.float32) + tfb_ref[...]
    fused = fv * ft                                   # (tm, rank*D) f32

    # Rank reduction with static lane-slice adds (VPU, MXU stays free).
    d = out_ref.shape[-1]
    rank = fused.shape[-1] // d
    acc = fused[:, 0:d]
    for r in range(1, rank):
        acc = acc + fused[:, r * d:(r + 1) * d]

    # TODO(synk): for bundle-visible store cost, pack the (tm, D=8) result into
    # a lane-dense (tm//16, 128) slab; output is a small fraction of traffic at
    # these shapes so it is left as-is.
    out_ref[...] = (acc + bias_ref[...]).astype(out_ref.dtype)


def _round_up(x, m):
    return ((x + m - 1) // m) * m


def lmf_prepare_params(video_factor, text_factor, fusion_weights, fusion_bias):
    """One-time parameter prep (hoisted out of the per-call forward path).

    Returns factor slabs of shape (feat, rank*D) with column index r*D + d,
    the bias (row 0) split off, and fusion_weights folded into the video
    factor so the kernel never touches them.
    """
    f32 = jnp.float32
    bf16 = jnp.bfloat16
    rank, vh1, out_dim = video_factor.shape
    _, to1, _ = text_factor.shape
    rd = rank * out_dim

    # Fold fusion_weights into the video factor: w_r * fv_r * ft_r.
    vf = video_factor.astype(f32) * fusion_weights.astype(f32).reshape(rank, 1, 1)
    tf = text_factor.astype(f32)

    vf_main = jnp.transpose(vf[:, 1:, :], (1, 0, 2)).reshape(vh1 - 1, rd).astype(bf16)
    vf_bias = jnp.transpose(vf[:, :1, :], (1, 0, 2)).reshape(1, rd)          # f32
    tf_main = jnp.transpose(tf[:, 1:, :], (1, 0, 2)).reshape(to1 - 1, rd).astype(bf16)
    tf_bias = jnp.transpose(tf[:, :1, :], (1, 0, 2)).reshape(1, rd)          # f32
    bias2d = fusion_bias.astype(f32).reshape(1, out_dim)

    return {
        "vf_main": vf_main, "vf_bias": vf_bias,
        "tf_main": tf_main, "tf_bias": tf_bias,
        "bias": bias2d, "rank": rank, "out_dim": out_dim,
    }


def _pick_tile(B):
    """Batch tile: large (step-overhead-bound otherwise), multiple of 16 for
    bf16 sublane packing, capped at 4096, and <= ~B/2 once B is big enough so
    the 'parallel' grid axis has >=2 steps (v7x's two TensorCores)."""
    if B < 32:
        return _round_up(B, 16)
    return min(4096, _round_up(pl.cdiv(B, 2), 16))


def lmf_forward(video_x, text_x, params):
    """Pallas implementation of LMF.forward (use_softmax=False)."""
    B, video_hidden = video_x.shape
    _, text_out = text_x.shape
    out_dim = params["out_dim"]
    rank = params["rank"]
    rd = rank * out_dim

    vf_main, vf_bias = params["vf_main"], params["vf_bias"]
    tf_main, tf_bias = params["tf_main"], params["tf_bias"]
    bias2d = params["bias"]
    assert vf_main.shape == (video_hidden, rd)
    assert tf_main.shape == (text_out, rd)

    # bf16 activations (kernel is HBM-bound); f32 accumulation inside the MXU.
    vx = video_x.astype(jnp.bfloat16)
    tx = text_x.astype(jnp.bfloat16)

    tm = _pick_tile(B)
    n_steps = pl.cdiv(B, tm)
    b_pad = n_steps * tm
    if b_pad != B:
        # Zero-pad the ragged tail so every block divides cleanly; padded rows
        # compute harmless finite values and are sliced off below.
        vx = jnp.pad(vx, ((0, b_pad - B), (0, 0)))
        tx = jnp.pad(tx, ((0, b_pad - B), (0, 0)))

    # TODO(synk): at production factor sizes (Vh, rank*D in the thousands),
    # add an 'arbitrary' grid axis tiling rd and set vmem_limit_bytes so the
    # resident factor slabs fit v7x's 64 MiB VMEM; at these shapes they are KBs.
    grid_spec = pltpu.PrefetchScalarGridSpec(
        num_scalar_prefetch=0,
        grid=(n_steps,),
        in_specs=[
            pl.BlockSpec((tm, video_hidden), lambda i: (i, 0)),   # video_x
            pl.BlockSpec((tm, text_out), lambda i: (i, 0)),       # text_x
            pl.BlockSpec((video_hidden, rd), lambda i: (0, 0)),   # vf_main
            pl.BlockSpec((1, rd), lambda i: (0, 0)),              # vf_bias
            pl.BlockSpec((text_out, rd), lambda i: (0, 0)),       # tf_main
            pl.BlockSpec((1, rd), lambda i: (0, 0)),              # tf_bias
            pl.BlockSpec((1, out_dim), lambda i: (0, 0)),         # fusion_bias
        ],
        out_specs=pl.BlockSpec((tm, out_dim), lambda i: (i, 0)),
    )

    out = pl.pallas_call(
        lmf_kernel,
        out_shape=jax.ShapeDtypeStruct((b_pad, out_dim), jnp.float32),
        grid_spec=grid_spec,
        compiler_params=pltpu.CompilerParams(
            dimension_semantics=("parallel",)),
    )(vx, tx, vf_main, vf_bias, tf_main, tf_bias, bias2d)

    return out[:B] if b_pad != B else out


def lmf_reference(video_x, text_x, video_factor, text_factor,
                  fusion_weights, fusion_bias):
    """Pure-JAX f32 reference matching the PyTorch forward."""
    B = video_x.shape[0]
    ones = jnp.ones((B, 1), dtype=jnp.float32)
    vh = jnp.concatenate([ones, video_x], axis=1)
    th = jnp.concatenate([ones, text_x], axis=1)
    fusion_video = jnp.einsum('bi,rio->rbo', vh, video_factor)
    fusion_text = jnp.einsum('bi,rio->rbo', th, text_factor)
    fusion_zy = fusion_video * fusion_text                      # (rank, B, D)
    out = jnp.einsum('xr,rbo->bo', fusion_weights, fusion_zy) + fusion_bias
    return out


def xavier_normal(key, shape):
    """torch.nn.init.xavier_normal_ equivalent for 2D/3D tensors."""
    receptive = 1
    for d in shape[2:]:
        receptive *= d
    fan_in = shape[1] * receptive
    fan_out = shape[0] * receptive
    std = (2.0 / (fan_in + fan_out)) ** 0.5
    return std * jax.random.normal(key, shape, dtype=jnp.float32)


if __name__ == "__main__":
    # Module hyperparameters (small, consistent with the forward pass).
    video_hidden = 32
    text_out = 16
    output_dim = 8
    rank = 4
    batch = 2

    key = jax.random.PRNGKey(0)
    k_vf, k_tf, k_w, k_v, k_t = jax.random.split(key, 5)

    # Parameters (xavier_normal_ like PyTorch, fusion_bias = 0).
    video_factor = xavier_normal(k_vf, (rank, video_hidden + 1, output_dim))
    text_factor = xavier_normal(k_tf, (rank, text_out + 1, output_dim))
    fusion_weights = xavier_normal(k_w, (1, rank))
    fusion_bias = jnp.zeros((1, output_dim), dtype=jnp.float32)

    # Inputs. NOTE: despite the PyTorch docstring, torch.cat(dim=1) with a 2D
    # ones tensor requires text_x to be 2D of shape (batch, text_out).
    video_x = jax.random.normal(k_v, (batch, video_hidden), dtype=jnp.float32)
    text_x = jax.random.normal(k_t, (batch, text_out), dtype=jnp.float32)

    # One-time parameter prep (would live at module init in a real model).
    params = lmf_prepare_params(video_factor, text_factor,
                                fusion_weights, fusion_bias)

    out = lmf_forward(video_x, text_x, params)
    out = jax.block_until_ready(out)

    ref = lmf_reference(video_x, text_x, video_factor, text_factor,
                        fusion_weights, fusion_bias)
    assert out.shape == (batch, output_dim)
    # bf16 activations/factor slabs with f32 accumulation: loosened tolerance.
    assert jnp.allclose(out, ref, atol=5e-2, rtol=5e-2), (out, ref)

    print("KERNEL_OK")
</pallas_src>

<mosaic_0001>
module attributes {stable_mosaic.version = 11 : i64} {
  func.func @lmf_kernel(%arg0: i32, %arg1: memref<16x32xbf16, #tpu.memory_space<vmem>>, %arg2: memref<16x16xbf16, #tpu.memory_space<vmem>>, %arg3: memref<32x32xbf16, #tpu.memory_space<vmem>>, %arg4: memref<1x32xf32, #tpu.memory_space<vmem>>, %arg5: memref<16x32xbf16, #tpu.memory_space<vmem>>, %arg6: memref<1x32xf32, #tpu.memory_space<vmem>>, %arg7: memref<1x8xf32, #tpu.memory_space<vmem>>, %arg8: memref<16x8xf32, #tpu.memory_space<vmem>>) attributes {dimension_semantics = [#tpu.dimension_semantics<parallel>], iteration_bounds = array<i64: 1>, scalar_prefetch = 0 : i64, scratch_operands = 0 : i64, tpu.core_type = #tpu.core_type<tc>, window_params = [{transform_indices = @transform_0, window_bounds = array<i64: 16, 32>}, {transform_indices = @transform_1, window_bounds = array<i64: 16, 16>}, {pipeline_mode = #tpu.pipeline_mode<synchronous>, transform_indices = @transform_2, window_bounds = array<i64: 32, 32>}, {pipeline_mode = #tpu.pipeline_mode<synchronous>, transform_indices = @transform_3, window_bounds = array<i64: 1, 32>}, {pipeline_mode = #tpu.pipeline_mode<synchronous>, transform_indices = @transform_4, window_bounds = array<i64: 16, 32>}, {pipeline_mode = #tpu.pipeline_mode<synchronous>, transform_indices = @transform_5, window_bounds = array<i64: 1, 32>}, {pipeline_mode = #tpu.pipeline_mode<synchronous>, transform_indices = @transform_6, window_bounds = array<i64: 1, 8>}, {transform_indices = @transform_7, window_bounds = array<i64: 16, 8>}]} {
    %c0 = arith.constant 0 : index
    %c0_0 = arith.constant 0 : index
    %0 = vector.load %arg1[%c0, %c0_0] : memref<16x32xbf16, #tpu.memory_space<vmem>>, vector<16x32xbf16>
    %c0_1 = arith.constant 0 : index
    %c0_2 = arith.constant 0 : index
    %1 = vector.load %arg3[%c0_1, %c0_2] : memref<32x32xbf16, #tpu.memory_space<vmem>>, vector<32x32xbf16>
    %cst = arith.constant dense<0.000000e+00> : vector<16x32xf32>
    %2 = tpu.matmul %0, %1, %cst {dimension_numbers = #tpu.dot_dimension_numbers<[1], [0], [0], [1], [0, 0, 1, 1], [], []>} : vector<16x32xbf16>, vector<32x32xbf16>, vector<16x32xf32> -> vector<16x32xf32>
    %c0_3 = arith.constant 0 : index
    %c0_4 = arith.constant 0 : index
    %3 = vector.load %arg4[%c0_3, %c0_4] : memref<1x32xf32, #tpu.memory_space<vmem>>, vector<1x32xf32>
    %4 = vector.broadcast %3 : vector<1x32xf32> to vector<16x32xf32>
    %5 = arith.addf %2, %4 : vector<16x32xf32>
    %c0_5 = arith.constant 0 : index
    %c0_6 = arith.constant 0 : index
    %6 = vector.load %arg2[%c0_5, %c0_6] : memref<16x16xbf16, #tpu.memory_space<vmem>>, vector<16x16xbf16>
    %c0_7 = arith.constant 0 : index
    %c0_8 = arith.constant 0 : index
    %7 = vector.load %arg5[%c0_7, %c0_8] : memref<16x32xbf16, #tpu.memory_space<vmem>>, vector<16x32xbf16>
    %cst_9 = arith.constant dense<0.000000e+00> : vector<16x32xf32>
    %8 = tpu.matmul %6, %7, %cst_9 {dimension_numbers = #tpu.dot_dimension_numbers<[1], [0], [0], [1], [0, 0, 1, 1], [], []>} : vector<16x16xbf16>, vector<16x32xbf16>, vector<16x32xf32> -> vector<16x32xf32>
    %c0_10 = arith.constant 0 : index
    %c0_11 = arith.constant 0 : index
    %9 = vector.load %arg6[%c0_10, %c0_11] : memref<1x32xf32, #tpu.memory_space<vmem>>, vector<1x32xf32>
    %10 = vector.broadcast %9 : vector<1x32xf32> to vector<16x32xf32>
    %11 = arith.addf %8, %10 : vector<16x32xf32>
    %12 = arith.mulf %5, %11 : vector<16x32xf32>
    %13 = vector.extract_strided_slice %12 {offsets = [0, 0], sizes = [16, 8], strides = [1, 1]} : vector<16x32xf32> to vector<16x8xf32>
    %14 = vector.extract_strided_slice %12 {offsets = [0, 8], sizes = [16, 8], strides = [1, 1]} : vector<16x32xf32> to vector<16x8xf32>
    %15 = arith.addf %13, %14 : vector<16x8xf32>
    %16 = vector.extract_strided_slice %12 {offsets = [0, 16], sizes = [16, 8], strides = [1, 1]} : vector<16x32xf32> to vector<16x8xf32>
    %17 = arith.addf %15, %16 : vector<16x8xf32>
    %18 = vector.extract_strided_slice %12 {offsets = [0, 24], sizes = [16, 8], strides = [1, 1]} : vector<16x32xf32> to vector<16x8xf32>
    %19 = arith.addf %17, %18 : vector<16x8xf32>
    %c0_12 = arith.constant 0 : index
    %c0_13 = arith.constant 0 : index
    %20 = vector.load %arg7[%c0_12, %c0_13] : memref<1x8xf32, #tpu.memory_space<vmem>>, vector<1x8xf32>
    %21 = vector.broadcast %20 : vector<1x8xf32> to vector<16x8xf32>
    %22 = arith.addf %19, %21 : vector<16x8xf32>
    %c0_14 = arith.constant 0 : index
    %c0_15 = arith.constant 0 : index
    %23 = vector.load %arg8[%c0_14, %c0_15] : memref<16x8xf32, #tpu.memory_space<vmem>>, vector<16x8xf32>
    tpu.vector_store %arg8[%c0_14, %c0_15], %22 {strides = array<i32>} : memref<16x8xf32, #tpu.memory_space<vmem>>, vector<16x8xf32>,
    return
  }
  func.func @transform_0(%arg0: i32) -> (i32, i32) {
    %c0_i32 = arith.constant 0 : i32
    %c0_i32_0 = arith.constant 0 : i32
    return %arg0, %c0_i32 : i32, i32
  }
  func.func @transform_1(%arg0: i32) -> (i32, i32) {
    %c0_i32 = arith.constant 0 : i32
    %c0_i32_0 = arith.constant 0 : i32
    return %arg0, %c0_i32 : i32, i32
  }
  func.func @transform_2(%arg0: i32) -> (i32, i32) {
    %c0_i32 = arith.constant 0 : i32
    %c0_i32_0 = arith.constant 0 : i32
    %c0_i32_1 = arith.constant 0 : i32
    return %c0_i32, %c0_i32_0 : i32, i32
  }
  func.func @transform_3(%arg0: i32) -> (i32, i32) {
    %c0_i32 = arith.constant 0 : i32
    %c0_i32_0 = arith.constant 0 : i32
    %c0_i32_1 = arith.constant 0 : i32
    return %c0_i32, %c0_i32_0 : i32, i32
  }
  func.func @transform_4(%arg0: i32) -> (i32, i32) {
    %c0_i32 = arith.constant 0 : i32
    %c0_i32_0 = arith.constant 0 : i32
    %c0_i32_1 = arith.constant 0 : i32
    return %c0_i32, %c0_i32_0 : i32, i32
  }
  func.func @transform_5(%arg0: i32) -> (i32, i32) {
    %c0_i32 = arith.constant 0 : i32
    %c0_i32_0 = arith.constant 0 : i32
    %c0_i32_1 = arith.constant 0 : i32
    return %c0_i32, %c0_i32_0 : i32, i32
  }
  func.func @transform_6(%arg0: i32) -> (i32, i32) {
    %c0_i32 = arith.constant 0 : i32
    %c0_i32_0 = arith.constant 0 : i32
    %c0_i32_1 = arith.constant 0 : i32
    return %c0_i32, %c0_i32_0 : i32, i32
  }
  func.func @transform_7(%arg0: i32) -> (i32, i32) {
    %c0_i32 = arith.constant 0 : i32
    %c0_i32_0 = arith.constant 0 : i32
    return %arg0, %c0_i32 : i32, i32
  }
}

</mosaic_0001>

<bundles_post_ra>
// kernel: tpu_custom_call.1
= control target key start
LH: loop header
LB: loop body
LE: loop exit
PB: predicated region body
PF: predicated region fallthrough
CT: control target
= control target key end

     0   :  { %12 = vsyncpa [#allocation3], 0  ;;  %s490_s0 = inlined_call_operand.hbm [shape: bf16[16,32], index: 0, kind: input, shape index: {}]   ;;  %s491_s1 = inlined_call_operand.hbm [shape: bf16[16,16], index: 1, kind: input, shape index: {}]   ;;  %s492_s2 = inlined_call_operand.hbm [shape: bf16[32,32], index: 2, kind: input, shape index: {}]   ;;  %s493_s3 = inlined_call_operand.vmem [shape: f32[1,32], index: 3, kind: input, shape index: {}]   ;;  %s494_s4 = inlined_call_operand.vmem [shape: bf16[16,32], index: 4, kind: input, shape index: {}]   ;;  %s495_s5 = inlined_call_operand.vmem [shape: f32[1,32], index: 5, kind: input, shape index: {}]   ;;  %s496_s6 = inlined_call_operand.vmem [shape: f32[1,8], index: 6, kind: input, shape index: {}]   ;;  %s497_s7 = inlined_call_operand.vmem [shape: f32[16,8], index: 7, kind: output, shape index: {}]  }
   0x1   :  { %13 = vsyncpa [#allocation5], 0  ;;  %s370_s24 = smov [#allocation4]   ;;  %s371_s26 = smov [#allocation2]  }
   0x2   :  { %s31_s25 = sshll.u32 %s370_s24, 4  ;;  %s19_s27 = sshll.u32 %s371_s26, 4  ;;  %s32_s25 = int_to_ptr.vmem [resolvable:$true] %s31_s25  ;;  %s420_s27 = int_to_ptr.vmem [resolvable:$true] %s19_s27 }
   0x3   :  { %s300_s30 = scalar_lea.hbm %s491_s1, 128 }
   0x4   :  { %p301_p0 = scmp.ne.s32.totalorder %s491_s1, %s300_s30  ;;  %p304_p1 = scmp.lt.u32.totalorder %s300_s30, %s491_s1 }
   0x6   :  { %p306_p2 = pnand %p304_p1, %p301_p0 }
   0x8   :  { %309 = shalt.err (!%p306_p2)
}
   0x9   :  { %s310_s12 = scalar_lea.vmem %s32_s25, 128  ;;  %p315_p4 = scmp.lt.s32.totalorder %s32_s25, %s32_s25 }
   0xa   :  { %p311_p3 = scmp.ne.s32.totalorder %s32_s25, %s310_s12  ;;  %p316_p5 = scmp.lt.s32.totalorder %s310_s12, %s310_s12 }
   0xc   :  { %p317_p6 = por %p316_p5, %p315_p4 }
   0xe   :  { %p318_p7 = pnand %p317_p6, %p311_p3 }
  0x10   :  { %321 = shalt.err (!%p318_p7)
}
  0x11   :  { %s372_s13 = smov 64   ;;  %s373_s14 = smov 4  }
  0x12   :  { %37 = dma.hbm_to_vmem [thread:$0]  %s491_s1, 128, %s32_s25, [#allocation5], %s372_s13, %s372_s13, %s373_s14  }
  0x13   :  { %s322_s19 = scalar_lea.hbm %s490_s0, 128 }
  0x14   :  { %p323_p8 = scmp.ne.s32.totalorder %s490_s0, %s322_s19  ;;  %p326_p9 = scmp.lt.u32.totalorder %s322_s19, %s490_s0 }
  0x16   :  { %p328_p10 = pnand %p326_p9, %p323_p8 }
  0x18   :  { %331 = shalt.err (!%p328_p10)
}
  0x19   :  { %s332_s24 = scalar_lea.vmem %s420_s27, 128  ;;  %p337_p12 = scmp.lt.s32.totalorder %s420_s27, %s420_s27 }
  0x1a   :  { %p333_p11 = scmp.ne.s32.totalorder %s420_s27, %s332_s24  ;;  %p338_p13 = scmp.lt.s32.totalorder %s332_s24, %s332_s24 }
  0x1c   :  { %p339_p0 = por %p338_p13, %p337_p12 }
  0x1e   :  { %p340_p1 = pnand %p339_p0, %p333_p11 }
  0x20   :  { %343 = shalt.err (!%p340_p1)
}
  0x21   :  { %25 = dma.hbm_to_vmem [thread:$0]  %s490_s0, 128, %s420_s27, [#allocation3], %s372_s13, %s372_s13, %s373_s14  }
  0x22   :  { %s374_s26 = smov [#allocation6]   ;;  %s344_s8 = scalar_lea.hbm %s492_s2, 256 }
  0x23   :  { %s43_s28 = sshll.u32 %s374_s26, 4  ;;  %p345_p2 = scmp.ne.s32.totalorder %s492_s2, %s344_s8  ;;  %s44_s28 = int_to_ptr.vmem [resolvable:$true] %s43_s28 }
  0x24   :  { %p348_p3 = scmp.lt.u32.totalorder %s344_s8, %s492_s2 }
  0x26   :  { %p350_p4 = pnand %p348_p3, %p345_p2 }
  0x28   :  { %353 = shalt.err (!%p350_p4)
}
  0x29   :  { %s354_s15 = scalar_lea.vmem %s44_s28, 256  ;;  %p359_p6 = scmp.lt.s32.totalorder %s44_s28, %s44_s28 }
  0x2a   :  { %p355_p5 = scmp.ne.s32.totalorder %s44_s28, %s354_s15  ;;  %p360_p7 = scmp.lt.s32.totalorder %s354_s15, %s354_s15 }
  0x2c   :  { %p361_p8 = por %p360_p7, %p359_p6 }
  0x2e   :  { %p362_p9 = pnand %p361_p8, %p355_p5 }
  0x30   :  { %365 = shalt.err (!%p362_p9)
}
  0x31   :  { %49 = dma.hbm_to_vmem [thread:$0]  %s492_s2, 256, %s44_s28, [#allocation5], %s372_s13, %s372_s13, %s373_s14  }
  0x32   :  { %366 = dma.done.wait [#allocation3], 128  }
  0x33   :  { %367 = vsyncadd [#allocation3], 4294967168 }
  0x34   :  { %368 = dma.done.wait [#allocation5], 384  }
  0x35   :  { %369 = vsyncadd [#allocation5], 4294966912  ;;  %v375_v0 = vmov 0.0   ;;  %vm376_vm0 = vmmov 0   ;;  %v295_v1 = vld [vmem:[#allocation6] sm:$0xff]   ;;  %v296_v2 = vld [vmem:[%s494_s4] sm:$0xff]  }
  0x36   :  { %271 = vmatprep.subr.bf16.mxu0 %v375_v0  ;;  %279 = vmatprep.subr.bf16.mxu1 %v375_v0  ;;  %v297_v3 = vld [vmem:[#allocation6 + $0x8] sm:$0xff]   ;;  %v298_v4 = vld [vmem:[#allocation4] sm:$0xff]   ;;  %vm165_vm1 = vcmask 130048   ;;  %v299_v5 = vld [vmem:[#allocation2] sm:$0xff]   ;;  %vm98_vm2 = vcmask 261120   ;;  %s377_s4 = smov 112  }
  0x37   :  { %281 = vmatprep.mubr.msk.bf16.mxu1 %vm376_vm0, %v375_v0  ;;  %275 = vmatprep.mubr.msk.bf16.mxu0 %vm376_vm0, %v375_v0  ;;  %v261_v6 = vld [vmem:[%s495_s5] ss:$0 sm:$0xff]  ;;  %s378_s5 = smov 120   ;;  %s379_s19 = smov 104   ;;  %vm247_vm3 = vcmask 64512  }
  0x38   :  { %272 = vmatpush3.bf16.msra.mxu0 %v295_v1  ;;  %280 = vmatpush3.bf16.msra.mxu1 %v296_v2  ;;  %v256_v9 = vld [vmem:[%s493_s3] ss:$0 sm:$0xff] }
  0x39   :  { %273 = vmatprep.subr.bf16.mxu0 %v375_v0  ;;  %v265_v30 = vld [vmem:[%s496_s6] ss:$0 sm:$0xff] }
  0x3b   :  { %282 = vmatmul.mubr.msk.bf16.vlgmr.msra.gmra.mrb[0].mxu1 %vm165_vm1, %v298_v4 }
  0x3c   :  { %274 = vmatpush3.bf16.msra.mxu0 %v297_v3 }
  0x3f   :  { %276 = vmatmul.mubr.msk.bf16.vlgmr.msra.gmra.mrb[0].mxu0 %vm98_vm2, %v299_v5 }
 0x10e   :  { %v203_v7 = vpop.f32.mrb[0].mxu1 }
 0x10f   :  { %v283_v8 = vpop.f32.mrb[1].mxu1  ;;  %v204_v10 = vadd.f32 %v261_v6, %v203_v7 }
 0x110   :  { %v206_v11 = vpop.f32.mrb[2].mxu1 }
 0x111   :  { %v284_v13 = vpop.f32.mrb[3].mxu1  ;;  %v207_v17 = vadd.f32 %v261_v6, %v206_v11 }
 0x112   :  { %v136_v12 = vpop.f32.mrb[0].mxu0 }
 0x113   :  { %v137_v14 = vadd.f32 %v256_v9, %v136_v12  ;;  %v277_v15 = vpop.f32.mrb[1].mxu0 }
 0x114   :  { %v139_v16 = vpop.f32.mrb[2].mxu0 }
 0x115   :  { %v210_v18 = vmul.f32 %v204_v10, %v137_v14  ;;  %v140_v19 = vadd.f32 %v256_v9, %v139_v16  ;;  %v278_v20 = vpop.f32.mrb[3].mxu0 }
 0x117   :  { %v211_v21 = vmul.f32 %v207_v17, %v140_v19  ;;  %222 = vrot.lane.b32.xlu1 %v210_v18, %s377_s4  ;;  %214 = vrot.lane.b32.xlu0 %v210_v18, %s378_s5 }
 0x11b   :  { %224 = vrot.lane.b32.xlu1 %v211_v21, %s377_s4  ;;  %216 = vrot.lane.b32.xlu0 %v211_v21, %s378_s5 }
 0x11f   :  { %232 = vrot.lane.b32.xlu1 %v211_v21, %s379_s19  ;;  %230 = vrot.lane.b32.xlu0 %v210_v18, %s379_s19 }
 0x189   :  { %v223_v22 = vpop.permute.xlu1 %222  ;;  %v215_v23 = vpop.permute.xlu0 %214 }
 0x18a   :  { %v220_v24 = vadd.f32 %v215_v23, %v210_v18 }
 0x18c   :  { %v228_v29 = vadd.f32 %v223_v22, %v220_v24 }
 0x18d   :  { %v225_v25 = vpop.permute.xlu1 %224  ;;  %v217_v26 = vpop.permute.xlu0 %216 }
 0x18e   :  { %v221_v27 = vadd.f32 %v217_v26, %v211_v21 }
 0x190   :  { %v229_v28 = vadd.f32 %v225_v25, %v221_v27 }
 0x191   :  { %v233_v31 = vpop.permute.xlu1 %232  ;;  %v231_v32 = vpop.permute.xlu0 %230 }
 0x192   :  { %v237_v33 = vadd.f32 %v233_v31, %v229_v28  ;;  %v236_v34 = vadd.f32 %v231_v32, %v228_v29 }
 0x194   :  { %v246_v35 = vadd.f32 %v265_v30, %v237_v33  ;;  %v245_v36 = vadd.f32 %v265_v30, %v236_v34 }
 0x196   :  { %249 = vst.msk [vmem:[%s497_s7 + $0x8] sm:$0xff] %vm247_vm3, %v246_v35  ;;  %248 = vst.msk [vmem:[%s497_s7] sm:$0xff] %vm247_vm3, %v245_v36 }
 0x197   :  { %254 = vsyncpa [#allocation3], 1 }
 0x198   :  { %255 = vsyncpa [#allocation5], 1 }

</bundles_post_ra>
